<compile_context>
chip_gen: v7x
topology: tpu7x:2x2x1
jax: 0.10.0
libtpu: 0.0.40
codegen_flags: <defaults>
</compile_context>

<pallas_src>
import functools

import jax
import jax.numpy as jnp
import numpy as np
from jax.experimental import pallas as pl
from jax.experimental.pallas import tpu as pltpu


# ----------------------------- Pallas kernels -----------------------------

def _fused_relu_conv_stats_kernel(xw_ref, w_ref, conv_ref, sum_ref, sq_ref, *,
                                  KH, row_starts, n_rows, C_out):
    """ReLU + conv (as KH shifted matmuls) + per-image BN partial stats.

    xw_ref  : (R, KW*C_in)        bf16  W-im2col rows of one padded image
    w_ref   : (KH, KW*C_in, C_out) bf16
    conv_ref: (C_out, Ho*Wo)      f32   lane-dense conv output (NCHW slab)
    sum_ref : (C_out, 1)          f32   per-image channel sum
    sq_ref  : (C_out, 1)          f32   per-image channel sum of squares
    """
    acc = jnp.zeros((n_rows, C_out), jnp.float32)
    for kh in range(KH):                      # static unroll, KH small
        r0 = row_starts[kh]
        xs = jnp.maximum(xw_ref[r0:r0 + n_rows, :], 0)        # fused ReLU (bf16)
        acc = acc + jnp.dot(xs, w_ref[kh],
                            preferred_element_type=jnp.float32)
    # Lane-dense layout: (C_out, Ho*Wo) -> last dim Ho*Wo is a multiple of 128.
    acc_t = acc.T
    conv_ref[...] = acc_t
    # Partial BN stats from the lane-major accumulator (2 vregs) in-register.
    sum_ref[...] = jnp.sum(acc_t, axis=1, keepdims=True)
    sq_ref[...] = jnp.sum(acc_t * acc_t, axis=1, keepdims=True)


def _bn_apply_kernel(x_ref, sum_ref, sq_ref, gamma_ref, beta_ref, o_ref, *,
                     total, eps):
    """Finalize BN stats (combine per-image partials) and normalize one image.

    x_ref/o_ref : (C_out, Ho*Wo) f32     sum/sq: (N, C_out, 1) f32
    gamma/beta  : (C_out, 1)     f32
    """
    inv_m = jnp.float32(1.0 / total)
    ch_sum = jnp.sum(sum_ref[...], axis=0)            # (C_out, 1)
    ch_sq = jnp.sum(sq_ref[...], axis=0)              # (C_out, 1)
    mean = ch_sum * inv_m
    # E[x^2]-E[x]^2 in f32 (biased, like the BN forward); switch to a two-pass
    # variance if tighter numerics are ever required.
    var = ch_sq * inv_m - mean * mean
    scale = gamma_ref[...] * jax.lax.rsqrt(var + eps)
    shift = beta_ref[...] - mean * scale
    o_ref[...] = x_ref[...] * scale + shift


# ------------------------------- wrapper ----------------------------------

def _vmem_limit_bytes(buffer_bytes):
    # generous: raw pipeline-buffer bytes x2 for lane/sublane padding + headroom
    return int(min(max(2 * buffer_bytes + (2 << 20), 8 << 20), 64 << 20))


def relu_conv_bn(x_nchw, weight_oihw, gamma, beta, *, stride, padding,
                 eps=1e-5):
    """Forward pass of ReLUConvBN. x_nchw: (N, C_in, H, W) float32 -> NCHW out."""
    N, C_in, H, W = x_nchw.shape
    C_out, C_in_w, KH, KW = weight_oihw.shape
    assert C_in == C_in_w

    Ho = (H + 2 * padding - KH) // stride + 1
    Wo = (W + 2 * padding - KW) // stride + 1
    HoWo = Ho * Wo
    M = N * HoWo
    KWC = KW * C_in

    # ---- glue: NCHW -> NHWC, zero-pad, KW-fold W-im2col, bf16 cast ---------
    x = jnp.transpose(x_nchw, (0, 2, 3, 1)).astype(jnp.float32)      # NHWC
    x_pad = jnp.pad(x, ((0, 0), (padding, padding), (padding, padding), (0, 0)))
    x_pad = x_pad.astype(jnp.bfloat16)     # bf16 MXU operands (f32 accumulate)

    if stride == 1:
        # xw[n, h*Wo + wo, kw*C_in + c] = x_pad[n, h, wo+kw, c]
        Hp = H + 2 * padding
        cols = [x_pad[:, :, kw:kw + Wo, :] for kw in range(KW)]
        xw = jnp.stack(cols, axis=3).reshape(N, Hp * Wo, KWC)
        row_starts = tuple(kh * Wo for kh in range(KH))
    else:
        # General stride: per-kh pre-strided rows (still only one contiguous
        # row window per kh inside the kernel).
        rows = []
        for kh in range(KH):
            taps = [x_pad[:, kh:kh + (Ho - 1) * stride + 1:stride,
                          kw:kw + (Wo - 1) * stride + 1:stride, :]
                    for kw in range(KW)]
            rows.append(jnp.stack(taps, axis=3).reshape(N, HoWo, KWC))
        xw = jnp.concatenate(rows, axis=1)
        row_starts = tuple(kh * HoWo for kh in range(KH))
    R = xw.shape[1]

    # weight (O, I, KH, KW) -> (KH, KW*C_in, C_out), matching patch order.
    w = jnp.transpose(weight_oihw, (2, 3, 1, 0)).reshape(KH, KWC, C_out)
    w = w.astype(jnp.bfloat16)

    kern1 = functools.partial(_fused_relu_conv_stats_kernel,
                              KH=KH, row_starts=row_starts,
                              n_rows=HoWo, C_out=C_out)

    # ---- kernel 1: fused ReLU + conv + partial BN stats --------------------
    buf1 = 2 * (R * KWC * 2 + C_out * HoWo * 4 + 2 * C_out * 4) \
        + KH * KWC * C_out * 2
    conv_t, part_sum, part_sq = pl.pallas_call(
        kern1,
        out_shape=(jax.ShapeDtypeStruct((N, C_out, HoWo), jnp.float32),
                   jax.ShapeDtypeStruct((N, C_out, 1), jnp.float32),
                   jax.ShapeDtypeStruct((N, C_out, 1), jnp.float32)),
        grid=(N,),
        in_specs=[
            pl.BlockSpec((None, R, KWC), lambda n: (n, 0, 0)),
            pl.BlockSpec((KH, KWC, C_out), lambda n: (0, 0, 0)),
        ],
        out_specs=(
            pl.BlockSpec((None, C_out, HoWo), lambda n: (n, 0, 0)),
            pl.BlockSpec((None, C_out, 1), lambda n: (n, 0, 0)),
            pl.BlockSpec((None, C_out, 1), lambda n: (n, 0, 0)),
        ),
        compiler_params=pltpu.CompilerParams(
            dimension_semantics=("parallel",),
            vmem_limit_bytes=_vmem_limit_bytes(buf1)),
        cost_estimate=pl.CostEstimate(
            flops=2 * M * KH * KWC * C_out,
            transcendentals=0,
            bytes_accessed=int(xw.size * 2 + w.size * 2
                               + N * C_out * HoWo * 4 + 2 * N * C_out * 4)),
    )(xw, w)

    # ---- kernel 2: fused BN finalize (mean/var/rsqrt/affine) + normalize ---
    gamma2 = gamma.astype(jnp.float32).reshape(C_out, 1)
    beta2 = beta.astype(jnp.float32).reshape(C_out, 1)
    kern2 = functools.partial(_bn_apply_kernel, total=M, eps=float(eps))

    buf2 = 2 * (2 * C_out * HoWo * 4) + 2 * N * C_out * 4 + 2 * C_out * 4
    y_t = pl.pallas_call(
        kern2,
        out_shape=jax.ShapeDtypeStruct((N, C_out, HoWo), jnp.float32),
        grid=(N,),
        in_specs=[
            pl.BlockSpec((None, C_out, HoWo), lambda n: (n, 0, 0)),
            pl.BlockSpec((N, C_out, 1), lambda n: (0, 0, 0)),
            pl.BlockSpec((N, C_out, 1), lambda n: (0, 0, 0)),
            pl.BlockSpec((C_out, 1), lambda n: (0, 0)),
            pl.BlockSpec((C_out, 1), lambda n: (0, 0)),
        ],
        out_specs=pl.BlockSpec((None, C_out, HoWo), lambda n: (n, 0, 0)),
        compiler_params=pltpu.CompilerParams(
            dimension_semantics=("parallel",),
            vmem_limit_bytes=_vmem_limit_bytes(buf2)),
        cost_estimate=pl.CostEstimate(
            flops=2 * N * C_out * HoWo + 8 * N * C_out,
            transcendentals=N * C_out,
            bytes_accessed=int(2 * N * C_out * HoWo * 4
                               + 2 * N * C_out * 4 + 2 * C_out * 4)),
    )(conv_t, part_sum, part_sq, gamma2, beta2)

    # (N, C_out, Ho*Wo) -> (N, C_out, Ho, Wo): pure reshape, already NCHW.
    return y_t.reshape(N, C_out, Ho, Wo)


# ------------------------------ reference ---------------------------------

def ref_relu_conv_bn(x, w, gamma, beta, *, stride, padding, eps=1e-5):
    # Precision-matched reference: the Pallas kernel feeds the MXU bf16
    # operands with f32 accumulation, so the reference conv does the same.
    xr = jnp.maximum(x, 0.0).astype(jnp.bfloat16)
    y = jax.lax.conv_general_dilated(
        xr, w.astype(jnp.bfloat16), window_strides=(stride, stride),
        padding=[(padding, padding), (padding, padding)],
        dimension_numbers=('NCHW', 'OIHW', 'NCHW'),
        preferred_element_type=jnp.float32)
    mean = jnp.mean(y, axis=(0, 2, 3), keepdims=True)
    var = jnp.var(y, axis=(0, 2, 3), keepdims=True)
    g = gamma.reshape(1, -1, 1, 1)
    b = beta.reshape(1, -1, 1, 1)
    return (y - mean) / jnp.sqrt(var + eps) * g + b


# -------------------------------- main -------------------------------------

if __name__ == "__main__":
    # Module config: ReLUConvBN(C_in=4, C_out=8, kernel_size=3, stride=1, padding=1)
    C_in, C_out, K, stride, padding = 4, 8, 3, 1, 1
    N, H, W = 2, 16, 16

    key = jax.random.PRNGKey(0)
    kx, kw = jax.random.split(key)
    x = jax.random.normal(kx, (N, C_in, H, W), dtype=jnp.float32)
    weight = jax.random.normal(kw, (C_out, C_in, K, K), dtype=jnp.float32) * 0.1
    gamma = jnp.ones((C_out,), dtype=jnp.float32)   # BatchNorm2d affine init
    beta = jnp.zeros((C_out,), dtype=jnp.float32)

    fwd = jax.jit(functools.partial(relu_conv_bn, stride=stride, padding=padding))
    out = fwd(x, weight, gamma, beta)
    out = jax.block_until_ready(out)

    ref = ref_relu_conv_bn(x, weight, gamma, beta, stride=stride, padding=padding)
    np.testing.assert_allclose(np.asarray(out), np.asarray(ref),
                               rtol=2e-3, atol=2e-3)

    print("KERNEL_OK")
</pallas_src>

<mosaic_0001>
module attributes {stable_mosaic.version = 11 : i64} {
  func.func @_fused_relu_conv_stats_kernel(%arg0: i32, %arg1: memref<1x288x12xbf16, #tpu.memory_space<vmem>>, %arg2: memref<3x12x8xbf16, #tpu.memory_space<vmem>>, %arg3: memref<1x8x256xf32, #tpu.memory_space<vmem>>, %arg4: memref<1x8x1xf32, #tpu.memory_space<vmem>>, %arg5: memref<1x8x1xf32, #tpu.memory_space<vmem>>) attributes {dimension_semantics = [#tpu.dimension_semantics<parallel>], iteration_bounds = array<i64: 2>, scalar_prefetch = 0 : i64, scratch_operands = 0 : i64, tpu.core_type = #tpu.core_type<tc>, window_params = [{transform_indices = @transform_0, window_bounds = array<i64: 1, 288, 12>}, {pipeline_mode = #tpu.pipeline_mode<synchronous>, transform_indices = @transform_1, window_bounds = array<i64: 3, 12, 8>}, {transform_indices = @transform_2, window_bounds = array<i64: 1, 8, 256>}, {transform_indices = @transform_3, window_bounds = array<i64: 1, 8, 1>}, {transform_indices = @transform_4, window_bounds = array<i64: 1, 8, 1>}]} {
    %cst = arith.constant 0.000000e+00 : f32
    %0 = vector.broadcast %cst : f32 to vector<256x8xf32>
    %c0 = arith.constant 0 : index
    %c0_0 = arith.constant 0 : index
    %c0_1 = arith.constant 0 : index
    %1 = vector.load %arg1[%c0, %c0_0, %c0_1] : memref<1x288x12xbf16, #tpu.memory_space<vmem>>, vector<1x256x12xbf16>
    %2 = vector.shape_cast %1 : vector<1x256x12xbf16> to vector<256x12xbf16>
    %cst_2 = arith.constant 0.000000e+00 : bf16
    %3 = vector.broadcast %cst_2 : bf16 to vector<256x12xbf16>
    %4 = arith.maximumf %2, %3 : vector<256x12xbf16>
    %c0_3 = arith.constant 0 : index
    %c0_4 = arith.constant 0 : index
    %c0_5 = arith.constant 0 : index
    %5 = vector.load %arg2[%c0_3, %c0_4, %c0_5] : memref<3x12x8xbf16, #tpu.memory_space<vmem>>, vector<1x12x8xbf16>
    %6 = vector.shape_cast %5 : vector<1x12x8xbf16> to vector<12x8xbf16>
    %cst_6 = arith.constant dense<0.000000e+00> : vector<256x8xf32>
    %7 = tpu.matmul %4, %6, %cst_6 {dimension_numbers = #tpu.dot_dimension_numbers<[1], [0], [0], [1], [0, 0, 1, 1], [], []>} : vector<256x12xbf16>, vector<12x8xbf16>, vector<256x8xf32> -> vector<256x8xf32>
    %8 = arith.addf %0, %7 : vector<256x8xf32>
    %c0_7 = arith.constant 0 : index
    %c16 = arith.constant 16 : index
    %c0_8 = arith.constant 0 : index
    %9 = vector.load %arg1[%c0_7, %c16, %c0_8] : memref<1x288x12xbf16, #tpu.memory_space<vmem>>, vector<1x256x12xbf16>
    %10 = vector.shape_cast %9 : vector<1x256x12xbf16> to vector<256x12xbf16>
    %cst_9 = arith.constant 0.000000e+00 : bf16
    %11 = vector.broadcast %cst_9 : bf16 to vector<256x12xbf16>
    %12 = arith.maximumf %10, %11 : vector<256x12xbf16>
    %c1 = arith.constant 1 : index
    %c0_10 = arith.constant 0 : index
    %c0_11 = arith.constant 0 : index
    %13 = vector.load %arg2[%c1, %c0_10, %c0_11] : memref<3x12x8xbf16, #tpu.memory_space<vmem>>, vector<1x12x8xbf16>
    %14 = vector.shape_cast %13 : vector<1x12x8xbf16> to vector<12x8xbf16>
    %cst_12 = arith.constant dense<0.000000e+00> : vector<256x8xf32>
    %15 = tpu.matmul %12, %14, %cst_12 {dimension_numbers = #tpu.dot_dimension_numbers<[1], [0], [0], [1], [0, 0, 1, 1], [], []>} : vector<256x12xbf16>, vector<12x8xbf16>, vector<256x8xf32> -> vector<256x8xf32>
    %16 = arith.addf %8, %15 : vector<256x8xf32>
    %c0_13 = arith.constant 0 : index
    %c32 = arith.constant 32 : index
    %c0_14 = arith.constant 0 : index
    %17 = vector.load %arg1[%c0_13, %c32, %c0_14] : memref<1x288x12xbf16, #tpu.memory_space<vmem>>, vector<1x256x12xbf16>
    %18 = vector.shape_cast %17 : vector<1x256x12xbf16> to vector<256x12xbf16>
    %cst_15 = arith.constant 0.000000e+00 : bf16
    %19 = vector.broadcast %cst_15 : bf16 to vector<256x12xbf16>
    %20 = arith.maximumf %18, %19 : vector<256x12xbf16>
    %c2 = arith.constant 2 : index
    %c0_16 = arith.constant 0 : index
    %c0_17 = arith.constant 0 : index
    %21 = vector.load %arg2[%c2, %c0_16, %c0_17] : memref<3x12x8xbf16, #tpu.memory_space<vmem>>, vector<1x12x8xbf16>
    %22 = vector.shape_cast %21 : vector<1x12x8xbf16> to vector<12x8xbf16>
    %cst_18 = arith.constant dense<0.000000e+00> : vector<256x8xf32>
    %23 = tpu.matmul %20, %22, %cst_18 {dimension_numbers = #tpu.dot_dimension_numbers<[1], [0], [0], [1], [0, 0, 1, 1], [], []>} : vector<256x12xbf16>, vector<12x8xbf16>, vector<256x8xf32> -> vector<256x8xf32>
    %24 = arith.addf %16, %23 : vector<256x8xf32>
    %25 = tpu.transpose %24, [1, 0] : vector<256x8xf32> -> vector<8x256xf32>
    %c0_19 = arith.constant 0 : index
    %c0_20 = arith.constant 0 : index
    %c0_21 = arith.constant 0 : index
    %26 = vector.load %arg3[%c0_19, %c0_20, %c0_21] : memref<1x8x256xf32, #tpu.memory_space<vmem>>, vector<1x8x256xf32>
    %27 = vector.shape_cast %26 : vector<1x8x256xf32> to vector<8x256xf32>
    %28 = vector.shape_cast %25 : vector<8x256xf32> to vector<1x8x256xf32>
    tpu.vector_store %arg3[%c0_19, %c0_20, %c0_21], %28 {strides = array<i32>} : memref<1x8x256xf32, #tpu.memory_space<vmem>>, vector<1x8x256xf32>,
    %cst_22 = arith.constant dense<0.000000e+00> : vector<8xf32>
    %29 = vector.multi_reduction <add>, %25, %cst_22 [1] : vector<8x256xf32> to vector<8xf32>
    %30 = vector.shape_cast %29 : vector<8xf32> to vector<8x1xf32>
    %c0_23 = arith.constant 0 : index
    %c0_24 = arith.constant 0 : index
    %c0_25 = arith.constant 0 : index
    %31 = vector.load %arg4[%c0_23, %c0_24, %c0_25] : memref<1x8x1xf32, #tpu.memory_space<vmem>>, vector<1x8x1xf32>
    %32 = vector.shape_cast %31 : vector<1x8x1xf32> to vector<8x1xf32>
    %33 = vector.shape_cast %30 : vector<8x1xf32> to vector<1x8x1xf32>
    tpu.vector_store %arg4[%c0_23, %c0_24, %c0_25], %33 {strides = array<i32>} : memref<1x8x1xf32, #tpu.memory_space<vmem>>, vector<1x8x1xf32>,
    %34 = arith.mulf %25, %25 : vector<8x256xf32>
    %cst_26 = arith.constant dense<0.000000e+00> : vector<8xf32>
    %35 = vector.multi_reduction <add>, %34, %cst_26 [1] : vector<8x256xf32> to vector<8xf32>
    %36 = vector.shape_cast %35 : vector<8xf32> to vector<8x1xf32>
    %c0_27 = arith.constant 0 : index
    %c0_28 = arith.constant 0 : index
    %c0_29 = arith.constant 0 : index
    %37 = vector.load %arg5[%c0_27, %c0_28, %c0_29] : memref<1x8x1xf32, #tpu.memory_space<vmem>>, vector<1x8x1xf32>
    %38 = vector.shape_cast %37 : vector<1x8x1xf32> to vector<8x1xf32>
    %39 = vector.shape_cast %36 : vector<8x1xf32> to vector<1x8x1xf32>
    tpu.vector_store %arg5[%c0_27, %c0_28, %c0_29], %39 {strides = array<i32>} : memref<1x8x1xf32, #tpu.memory_space<vmem>>, vector<1x8x1xf32>,
    return
  }
  func.func @transform_0(%arg0: i32) -> (i32, i32, i32) {
    %c0_i32 = arith.constant 0 : i32
    %c0_i32_0 = arith.constant 0 : i32
    %c0_i32_1 = arith.constant 0 : i32
    return %arg0, %c0_i32, %c0_i32_0 : i32, i32, i32
  }
  func.func @transform_1(%arg0: i32) -> (i32, i32, i32) {
    %c0_i32 = arith.constant 0 : i32
    %c0_i32_0 = arith.constant 0 : i32
    %c0_i32_1 = arith.constant 0 : i32
    %c0_i32_2 = arith.constant 0 : i32
    return %c0_i32, %c0_i32_0, %c0_i32_1 : i32, i32, i32
  }
  func.func @transform_2(%arg0: i32) -> (i32, i32, i32) {
    %c0_i32 = arith.constant 0 : i32
    %c0_i32_0 = arith.constant 0 : i32
    %c0_i32_1 = arith.constant 0 : i32
    return %arg0, %c0_i32, %c0_i32_0 : i32, i32, i32
  }
  func.func @transform_3(%arg0: i32) -> (i32, i32, i32) {
    %c0_i32 = arith.constant 0 : i32
    %c0_i32_0 = arith.constant 0 : i32
    %c0_i32_1 = arith.constant 0 : i32
    return %arg0, %c0_i32, %c0_i32_0 : i32, i32, i32
  }
  func.func @transform_4(%arg0: i32) -> (i32, i32, i32) {
    %c0_i32 = arith.constant 0 : i32
    %c0_i32_0 = arith.constant 0 : i32
    %c0_i32_1 = arith.constant 0 : i32
    return %arg0, %c0_i32, %c0_i32_0 : i32, i32, i32
  }
}

module attributes {stable_mosaic.version = 11 : i64} {
  func.func @_bn_apply_kernel(%arg0: i32, %arg1: memref<1x8x256xf32, #tpu.memory_space<vmem>>, %arg2: memref<2x8x1xf32, #tpu.memory_space<vmem>>, %arg3: memref<2x8x1xf32, #tpu.memory_space<vmem>>, %arg4: memref<8x1xf32, #tpu.memory_space<vmem>>, %arg5: memref<8x1xf32, #tpu.memory_space<vmem>>, %arg6: memref<1x8x256xf32, #tpu.memory_space<vmem>>) attributes {dimension_semantics = [#tpu.dimension_semantics<parallel>], iteration_bounds = array<i64: 2>, scalar_prefetch = 0 : i64, scratch_operands = 0 : i64, tpu.core_type = #tpu.core_type<tc>, window_params = [{transform_indices = @transform_0, window_bounds = array<i64: 1, 8, 256>}, {pipeline_mode = #tpu.pipeline_mode<synchronous>, transform_indices = @transform_1, window_bounds = array<i64: 2, 8, 1>}, {pipeline_mode = #tpu.pipeline_mode<synchronous>, transform_indices = @transform_2, window_bounds = array<i64: 2, 8, 1>}, {pipeline_mode = #tpu.pipeline_mode<synchronous>, transform_indices = @transform_3, window_bounds = array<i64: 8, 1>}, {pipeline_mode = #tpu.pipeline_mode<synchronous>, transform_indices = @transform_4, window_bounds = array<i64: 8, 1>}, {transform_indices = @transform_5, window_bounds = array<i64: 1, 8, 256>}]} {
    %c0 = arith.constant 0 : index
    %c0_0 = arith.constant 0 : index
    %c0_1 = arith.constant 0 : index
    %0 = vector.load %arg2[%c0, %c0_0, %c0_1] : memref<2x8x1xf32, #tpu.memory_space<vmem>>, vector<2x8x1xf32>
    %cst = arith.constant dense<0.000000e+00> : vector<8x1xf32>
    %1 = vector.multi_reduction <add>, %0, %cst [0] : vector<2x8x1xf32> to vector<8x1xf32>
    %c0_2 = arith.constant 0 : index
    %c0_3 = arith.constant 0 : index
    %c0_4 = arith.constant 0 : index
    %2 = vector.load %arg3[%c0_2, %c0_3, %c0_4] : memref<2x8x1xf32, #tpu.memory_space<vmem>>, vector<2x8x1xf32>
    %cst_5 = arith.constant dense<0.000000e+00> : vector<8x1xf32>
    %3 = vector.multi_reduction <add>, %2, %cst_5 [0] : vector<2x8x1xf32> to vector<8x1xf32>
    %cst_6 = arith.constant 0.001953125 : f32
    %4 = vector.broadcast %cst_6 : f32 to vector<8x1xf32>
    %5 = arith.mulf %1, %4 : vector<8x1xf32>
    %cst_7 = arith.constant 0.001953125 : f32
    %6 = vector.broadcast %cst_7 : f32 to vector<8x1xf32>
    %7 = arith.mulf %3, %6 : vector<8x1xf32>
    %8 = arith.mulf %5, %5 : vector<8x1xf32>
    %9 = arith.subf %7, %8 : vector<8x1xf32>
    %c0_8 = arith.constant 0 : index
    %c0_9 = arith.constant 0 : index
    %10 = vector.load %arg4[%c0_8, %c0_9] : memref<8x1xf32, #tpu.memory_space<vmem>>, vector<8x1xf32>
    %cst_10 = arith.constant 9.99999974E-6 : f32
    %11 = vector.broadcast %cst_10 : f32 to vector<8x1xf32>
    %12 = arith.addf %9, %11 : vector<8x1xf32>
    %13 = math.rsqrt %12 : vector<8x1xf32>
    %14 = arith.mulf %10, %13 : vector<8x1xf32>
    %c0_11 = arith.constant 0 : index
    %c0_12 = arith.constant 0 : index
    %15 = vector.load %arg5[%c0_11, %c0_12] : memref<8x1xf32, #tpu.memory_space<vmem>>, vector<8x1xf32>
    %16 = arith.mulf %5, %14 : vector<8x1xf32>
    %17 = arith.subf %15, %16 : vector<8x1xf32>
    %c0_13 = arith.constant 0 : index
    %c0_14 = arith.constant 0 : index
    %c0_15 = arith.constant 0 : index
    %18 = vector.load %arg1[%c0_13, %c0_14, %c0_15] : memref<1x8x256xf32, #tpu.memory_space<vmem>>, vector<1x8x256xf32>
    %19 = vector.shape_cast %18 : vector<1x8x256xf32> to vector<8x256xf32>
    %20 = vector.broadcast %14 : vector<8x1xf32> to vector<8x256xf32>
    %21 = arith.mulf %19, %20 : vector<8x256xf32>
    %22 = vector.broadcast %17 : vector<8x1xf32> to vector<8x256xf32>
    %23 = arith.addf %21, %22 : vector<8x256xf32>
    %c0_16 = arith.constant 0 : index
    %c0_17 = arith.constant 0 : index
    %c0_18 = arith.constant 0 : index
    %24 = vector.load %arg6[%c0_16, %c0_17, %c0_18] : memref<1x8x256xf32, #tpu.memory_space<vmem>>, vector<1x8x256xf32>
    %25 = vector.shape_cast %24 : vector<1x8x256xf32> to vector<8x256xf32>
    %26 = vector.shape_cast %23 : vector<8x256xf32> to vector<1x8x256xf32>
    tpu.vector_store %arg6[%c0_16, %c0_17, %c0_18], %26 {strides = array<i32>} : memref<1x8x256xf32, #tpu.memory_space<vmem>>, vector<1x8x256xf32>,
    return
  }
  func.func @transform_0(%arg0: i32) -> (i32, i32, i32) {
    %c0_i32 = arith.constant 0 : i32
    %c0_i32_0 = arith.constant 0 : i32
    %c0_i32_1 = arith.constant 0 : i32
    return %arg0, %c0_i32, %c0_i32_0 : i32, i32, i32
  }
  func.func @transform_1(%arg0: i32) -> (i32, i32, i32) {
    %c0_i32 = arith.constant 0 : i32
    %c0_i32_0 = arith.constant 0 : i32
    %c0_i32_1 = arith.constant 0 : i32
    %c0_i32_2 = arith.constant 0 : i32
    return %c0_i32, %c0_i32_0, %c0_i32_1 : i32, i32, i32
  }
  func.func @transform_2(%arg0: i32) -> (i32, i32, i32) {
    %c0_i32 = arith.constant 0 : i32
    %c0_i32_0 = arith.constant 0 : i32
    %c0_i32_1 = arith.constant 0 : i32
    %c0_i32_2 = arith.constant 0 : i32
    return %c0_i32, %c0_i32_0, %c0_i32_1 : i32, i32, i32
  }
  func.func @transform_3(%arg0: i32) -> (i32, i32) {
    %c0_i32 = arith.constant 0 : i32
    %c0_i32_0 = arith.constant 0 : i32
    %c0_i32_1 = arith.constant 0 : i32
    return %c0_i32, %c0_i32_0 : i32, i32
  }
  func.func @transform_4(%arg0: i32) -> (i32, i32) {
    %c0_i32 = arith.constant 0 : i32
    %c0_i32_0 = arith.constant 0 : i32
    %c0_i32_1 = arith.constant 0 : i32
    return %c0_i32, %c0_i32_0 : i32, i32
  }
  func.func @transform_5(%arg0: i32) -> (i32, i32, i32) {
    %c0_i32 = arith.constant 0 : i32
    %c0_i32_0 = arith.constant 0 : i32
    %c0_i32_1 = arith.constant 0 : i32
    return %arg0, %c0_i32, %c0_i32_0 : i32, i32, i32
  }
}

</mosaic_0001>

<bundles_post_ra>
// kernel: relu_conv_bn.3
= control target key start
LH: loop header
LB: loop body
LE: loop exit
PB: predicated region body
PF: predicated region fallthrough
CT: control target
= control target key end

     0   :  { %s384_s18 = smov 0   ;;  %s423_s0 = inlined_call_operand.vmem [shape: f32[2,8,256], index: 0, kind: input, shape index: {}]   ;;  %s424_s1 = inlined_call_operand.vmem [shape: f32[2,8,1], index: 1, kind: input, shape index: {}]   ;;  %s425_s2 = inlined_call_operand.vmem [shape: f32[2,8,1], index: 2, kind: input, shape index: {}]   ;;  %s426_s3 = inlined_call_operand.vmem [shape: f32[8,1], index: 3, kind: input, shape index: {}]   ;;  %s427_s4 = inlined_call_operand.vmem [shape: f32[8,1], index: 4, kind: input, shape index: {}]   ;;  %s428_s5 = inlined_call_operand.vmem [shape: f32[2,8,256], index: 5, kind: output, shape index: {}]  }
   0x1 LB: > { %s320_s19 = sadd.s32 4294967295, %s351_s18   ;;  %p324_p0 = scmp.ge.s32.totalorder %s351_s18, 1  ;;  %s351_s18 = sphi %s384_s18, %s15_s18  }
   0x2   : > { %p187_p1 = scmp.lt.s32.totalorder %s351_s18, 3 }
   0x4   : > { %p188_p2 = pnand %p324_p0, %p187_p1 }
   0x5   : > { %v225_v0 = vld [vmem:[%s424_s1] sm:$0xff] (!%p188_p2)  ;;  %v226_v1 = vld [vmem:[%s424_s1 + $0x8] sm:$0xff] (!%p188_p2)  ;;  %vm227_vm0 = vcmask (!%p188_p2), 7168   ;;  %v353_v3 = vmov (!%p188_p2), 0   ;;  %p215_p3 = scmp.lt.s32.totalorder (!%p188_p2), %s320_s19, 1 }
   0x6   : > { %191 = sbr.rel (%p188_p2) target bundleno = 165 (0xa5), region = 40  ;;  %v231_v2 = vld [vmem:[%s425_s2] sm:$0xff] (!%p188_p2)  ;;  %342 = vset.pattern.permute.xlu0 (!%p188_p2), %v353_v3  ;;  %v228_v4 = vsel (!%p188_p2), %vm227_vm0, %v225_v0, 0.0  ;;  %v229_v5 = vsel (!%p188_p2), %vm227_vm0, %v226_v1, 0.0  ;;  %v232_v6 = vld [vmem:[%s425_s2 + $0x8] sm:$0xff] (!%p188_p2) }
   0x7   : > { %v233_v7 = vsel (!%p188_p2), %vm227_vm0, %v231_v2, 0.0  ;;  %v230_v8 = vadd.f32 (!%p188_p2), %v229_v5, %v228_v4  ;;  %v234_v9 = vsel (!%p188_p2), %vm227_vm0, %v232_v6, 0.0  ;;  %v240_v16 = vld [vmem:[%s426_s3] sm:$0xff] (!%p188_p2) }
   0x8   : > { %v235_v10 = vadd.f32 (!%p188_p2), %v234_v9, %v233_v7  ;;  %v244_v19 = vld [vmem:[%s427_s4] sm:$0xff] (!%p188_p2) }
   0x9   : > { %v236_v11 = vmul.f32 (!%p188_p2), 0.001953125, %v230_v8 }
   0xa   : > { %v237_v12 = vmul.f32 (!%p188_p2), 0.001953125, %v235_v10 }
   0xb   : > { %v238_v13 = vmul.f32 (!%p188_p2), %v236_v11, %v236_v11 }
   0xd   : > { %v239_v14 = vsub.f32 %v237_v12, %v238_v13  ;;  %s430_s19 = smov (!%p215_p3, %s320_s19), 1 }
   0xe   : > { %s331_s7 = sshll.u32 %s430_s19, 4 }
   0xf   : > { %v241_v15 = vadd.f32 1e-05, %v239_v14  ;;  %s219_s10 = scalar_lea.vmem %s423_s0, %s331_s7  ;;  %s224_s13 = scalar_lea.vmem %s428_s5, %s331_s7 }
  0x10   : > { %v247_v23 = vld [vmem:[%s219_s10] sm:$0xff]  ;;  %v248_v24 = vld [vmem:[%s219_s10 + $0x8] sm:$0xff] }
  0x11   : > { %343 = vrsqrt.f32 %v241_v15 }
  0x1b   : > { %v344_v17 = vpop.eup %343 }
  0x1c   : > { %v243_v18 = vmul.f32 %v344_v17, %v240_v16 }
  0x1e   : > { %251 = vperm.xlu0 %342, %v243_v18   ;;  %v245_v20 = vmul.f32 %v243_v18, %v236_v11 }
  0x20   : > { %v246_v21 = vsub.f32 %v244_v19, %v245_v20 }
  0x22   : > { %258 = vperm.xlu0 %342, %v246_v21  }
  0x9d   : > { %v252_v22 = vpop.permute.xlu0 %251 }
  0x9e   : > { %v254_v25 = vmul.f32 %v252_v22, %v247_v23  ;;  %v255_v26 = vmul.f32 %v252_v22, %v248_v24 }
  0xa1   : > { %v259_v27 = vpop.permute.xlu0 %258 }
  0xa2   : > { %v261_v28 = vadd.f32 %v259_v27, %v254_v25  ;;  %v262_v29 = vadd.f32 %v259_v27, %v255_v26 }
  0xa4   : > { %263 = vst [vmem:[%s224_s13] sm:$0xff] %v261_v28  ;;  %264 = vst [vmem:[%s224_s13 + $0x8] sm:$0xff] %v262_v29 }
  0xa5 PF: > { %s15_s18 = sadd.s32 1, %s351_s18  }
  0xa6   : > { %p12_p4 = scmp.ge.s32.totalorder %s15_s18, 4  }
  0xa8   :  { %14 = sbr.rel (!%p12_p4) target bundleno = 1 (0x1), region = 70 }

// kernel: relu_conv_bn.2
= control target key start
LH: loop header
LB: loop body
LE: loop exit
PB: predicated region body
PF: predicated region fallthrough
CT: control target
= control target key end

     0   :  { %s1730_s15 = smov 0   ;;  %s2041_s0 = inlined_call_operand.vmem [shape: bf16[2,288,12], index: 0, kind: input, shape index: {}]   ;;  %s2042_s1 = inlined_call_operand.vmem [shape: bf16[3,12,8], index: 1, kind: input, shape index: {}]   ;;  %s2043_s2 = inlined_call_operand.vmem [shape: f32[2,8,256], index: 2, kind: output, shape index: {0}]   ;;  %s2044_s3 = inlined_call_operand.vmem [shape: f32[2,8,1], index: 3, kind: output, shape index: {1}]   ;;  %s2045_s4 = inlined_call_operand.vmem [shape: f32[2,8,1], index: 4, kind: output, shape index: {2}]  }
   0x1 LB: > { %s1359_s16 = sadd.s32 4294967295, %s1702_s15   ;;  %p1363_p0 = scmp.ge.s32.totalorder %s1702_s15, 1  ;;  %s1702_s15 = sphi %s1730_s15, %s15_s15  }
   0x2   : > { %p167_p1 = scmp.lt.s32.totalorder %s1702_s15, 3 }
   0x4   : > { %p168_p2 = pnand %p1363_p0, %p167_p1 }
   0x5   : > { %v1693_v0 = vld [vmem:[%s2042_s1 + $0x8] sm:$0x3f] (!%p168_p2)   ;;  %vm427_vm0 = vcmask (!%p168_p2), 1045504   ;;  %p201_p3 = scmp.lt.s32.totalorder (!%p168_p2), %s1359_s16, 1  ;;  %v1694_v1 = vld [vmem:[%s2042_s1] sm:$0x3f] (!%p168_p2)  }
   0x6   : > { %171 = sbr.rel (%p168_p2) target bundleno = 579 (0x243), region = 28  ;;  %1679 = vmatprep.subr.msk.bf16.mxu1 (!%p168_p2), %vm427_vm0, %v1693_v0  ;;  %v429_v2 = vsel (!%p168_p2), %vm427_vm0, %v1693_v0, 0  ;;  %1680 = vmatprep.subr.msk.bf16.mxu0 (!%p168_p2), %vm427_vm0, %v1694_v1  ;;  %v606_v3 = vsel (!%p168_p2), %vm427_vm0, %v1694_v1, 0  ;;  %v1695_v4 = vld [vmem:[%s2042_s1 + $0x10] sm:$0x3f] (!%p168_p2)   ;;  %v1704_v8 = vmov (!%p168_p2), 0  }
   0x7   : > { %1512 = vmatpush3.bf16.msra.mxu1 (!%p168_p2), %v429_v2  ;;  %1546 = vmatpush3.bf16.msra.mxu0 (!%p168_p2), %v606_v3  ;;  %vm378_vm1 = vcmask (!%p168_p2), 97280   ;;  %v970_v29 = vsel (!%p168_p2), %vm427_vm0, %v1695_v4, 0  ;;  %vm1234_vm2 = vcmask (!%p168_p2), 7168  }
   0x8   : > { %1681 = vmatprep.subr.msk.bf16.mxu1 (!%p168_p2), %vm427_vm0, %v1694_v1  ;;  %1682 = vmatprep.subr.msk.bf16.mxu0 (!%p168_p2), %vm427_vm0, %v1695_v4 }
   0xd   : > { %s2047_s16 = smov (!%p201_p3, %s1359_s16), 1 }
   0xe   : > { %s1683_s23 = smul.u32 144, %s2047_s16  ;;  %s1459_s27 = sshll.u32 %s2047_s16, 4 }
   0xf   : > { %s210_s30 = scalar_lea.vmem %s2043_s2, %s1459_s27  ;;  %s1367_s5 = sshll.u32 %s2047_s16, 3 }
  0x10   : > { %s1759_s26 = scalar_lea.vmem %s2041_s0, %s1683_s23  ;;  %s214_s8 = scalar_lea.vmem %s2044_s3, %s1367_s5 }
  0x11   : > { %v222_v5 = vld [vmem:[%s1759_s26 + $0x8] sm:$0xf]  ;;  %v223_v6 = vld [vmem:[%s1759_s26 + $0xc] sm:$0xf]  ;;  %v220_v7 = vld [vmem:[%s1759_s26] sm:$0xf]  ;;  %s218_s11 = scalar_lea.vmem %s2045_s4, %s1367_s5 }
  0x12   : > { %v254_v9 = vmax.bf16 %v1704_v8, %v222_v5  ;;  %v255_v10 = vmax.bf16 %v1704_v8, %v223_v6  ;;  %v221_v11 = vld [vmem:[%s1759_s26 + $0x4] sm:$0xf]  ;;  %v252_v12 = vmax.bf16 %v1704_v8, %v220_v7  ;;  %v224_v13 = vld [vmem:[%s1759_s26 + $0x10] sm:$0xf]  ;;  %v225_v14 = vld [vmem:[%s1759_s26 + $0x14] sm:$0xf] }
  0x13   : > { %v253_v15 = vmax.bf16 %v1704_v8, %v221_v11  ;;  %v256_v16 = vmax.bf16 %v1704_v8, %v224_v13  ;;  %v257_v17 = vmax.bf16 %v1704_v8, %v225_v14  ;;  %v226_v18 = vld [vmem:[%s1759_s26 + $0x18] sm:$0xf]  ;;  %v227_v19 = vld [vmem:[%s1759_s26 + $0x1c] sm:$0xf]  ;;  %v228_v23 = vld [vmem:[%s1759_s26 + $0x20] sm:$0xf] }
  0x14   : > { %v1371_v20 = vcombine.low %v254_v9, %v255_v10  ;;  %v258_v21 = vmax.bf16 %v1704_v8, %v226_v18  ;;  %v259_v22 = vmax.bf16 %v1704_v8, %v227_v19  ;;  %v229_v24 = vld [vmem:[%s1759_s26 + $0x24] sm:$0xf]  ;;  %v230_v27 = vld [vmem:[%s1759_s26 + $0x28] sm:$0xf]  ;;  %v231_v28 = vld [vmem:[%s1759_s26 + $0x2c] sm:$0xf]  ;;  %v260_v31 = vmax.bf16 %v1704_v8, %v228_v23 }
  0x15   : > { %v1404_v25 = vcombine.low %v252_v12, %v253_v15  ;;  %v1372_v26 = vcombine.low %v256_v16, %v257_v17  ;;  %v261_v32 = vmax.bf16 %v1704_v8, %v229_v24  ;;  %v262_v33 = vmax.bf16 %v1704_v8, %v230_v27  ;;  %v232_v37 = vld [vmem:[%s1759_s26 + $0x30] sm:$0xf]  ;;  %v233_v38 = vld [vmem:[%s1759_s26 + $0x34] sm:$0xf]  ;;  %v234_v39 = vld [vmem:[%s1759_s26 + $0x38] sm:$0xf] }
  0x16   : > { %1513 = vmatprep.mubr.msk.bf16.mxu1 %vm378_vm1, %v1371_v20  ;;  %v1373_v30 = vcombine.low %v258_v21, %v259_v22  ;;  %v263_v34 = vmax.bf16 %v1704_v8, %v231_v28  ;;  %v235_v40 = vld [vmem:[%s1759_s26 + $0x3c] sm:$0xf]  ;;  %v264_v41 = vmax.bf16 %v1704_v8, %v232_v37  ;;  %v265_v42 = vmax.bf16 %v1704_v8, %v233_v38  ;;  %v236_v45 = vld [vmem:[%s1759_s26 + $0x40] sm:$0xf]  ;;  %v237_v46 = vld [vmem:[%s1759_s26 + $0x44] sm:$0xf] }
  0x17   : > { %1547 = vmatprep.mubr.msk.bf16.mxu0 %vm378_vm1, %v1404_v25  ;;  %1514 = vmatmul.mubr.msk.bf16.vlgmr.msra.gmra.mrb[0].mxu1 %vm378_vm1, %v1372_v26  ;;  %v1374_v35 = vcombine.low %v260_v31, %v261_v32  ;;  %v266_v43 = vmax.bf16 %v1704_v8, %v234_v39  ;;  %v267_v44 = vmax.bf16 %v1704_v8, %v235_v40  ;;  %v238_v47 = vld [vmem:[%s1759_s26 + $0x48] sm:$0xf]  ;;  %v239_v48 = vld [vmem:[%s1759_s26 + $0x4c] sm:$0xf]  ;;  %v769_v50 = vld [vmem:[%s1759_s26 + $0x10] sm:$0xf] }
  0x18   : > { %1614 = vmatpush3.bf16.msra.mxu1 %v606_v3  ;;  %1548 = vmatmul.mubr.msk.bf16.vlgmr.msra.gmra.mrb[0].mxu0 %vm378_vm1, %v1371_v20  ;;  %v1375_v36 = vcombine.low %v262_v33, %v263_v34  ;;  %v1376_v49 = vcombine.low %v264_v41, %v265_v42  ;;  %v787_v51 = vld [vmem:[%s1759_s26 + $0x58] sm:$0xf]  ;;  %v788_v52 = vld [vmem:[%s1759_s26 + $0x5c] sm:$0xf]  ;;  %v789_v54 = vld [vmem:[%s1759_s26 + $0x60] sm:$0xf]  ;;  %v268_v57 = vmax.bf16 %v1704_v8, %v236_v45 }
  0x19   : > { %1580 = vmatpush3.bf16.msra.mxu0 %v970_v29  ;;  %1517 = vmatprep.mubr.msk.bf16.mxu1 %vm378_vm1, %v1373_v30  ;;  %v1377_v53 = vcombine.low %v266_v43, %v267_v44  ;;  %v790_v55 = vld [vmem:[%s1759_s26 + $0x64] sm:$0xf]  ;;  %v791_v56 = vld [vmem:[%s1759_s26 + $0x68] sm:$0xf]  ;;  %v269_v58 = vmax.bf16 %v1704_v8, %v237_v46  ;;  %v770_v59 = vld [vmem:[%s1759_s26 + $0x14] sm:$0xf]  ;;  %v270_v61 = vmax.bf16 %v1704_v8, %v238_v47 }
  0x1a   : > { %1551 = vmatprep.mubr.msk.bf16.mxu0 %vm378_vm1, %v1372_v26  ;;  %v792_v60 = vld [vmem:[%s1759_s26 + $0x6c] sm:$0xf]  ;;  %v271_v62 = vmax.bf16 %v1704_v8, %v239_v48  ;;  %v1821_v63 = vmax.bf16 %v1704_v8, %v787_v51  ;;  %v1824_v0 = vmax.bf16 %v1704_v8, %v788_v52  ;;  %v793_v1 = vld [vmem:[%s1759_s26 + $0x70] sm:$0xf]  ;;  %v794_v2 = vld [vmem:[%s1759_s26 + $0x74] sm:$0xf]  ;;  %v801_v4 = vmax.bf16 %v1704_v8, %v769_v50 }
  0x1b   : > { %v795_v3 = vld [vmem:[%s1759_s26 + $0x78] sm:$0xf]  ;;  %v1832_v5 = vmax.bf16 %v1704_v8, %v789_v54  ;;  %v1835_v6 = vmax.bf16 %v1704_v8, %v790_v55  ;;  %v1838_v7 = vmax.bf16 %v1704_v8, %v791_v56  ;;  %v796_v9 = vld [vmem:[%s1759_s26 + $0x7c] sm:$0xf]  ;;  %v797_v10 = vld [vmem:[%s1759_s26 + $0x80] sm:$0xf]  ;;  %v802_v12 = vmax.bf16 %v1704_v8, %v770_v59 }
  0x1c   : > { %v798_v11 = vld [vmem:[%s1759_s26 + $0x84] sm:$0xf]  ;;  %v1433_v13 = vcombine.low %v1821_v63, %v1824_v0  ;;  %v1849_v14 = vmax.bf16 %v1704_v8, %v792_v60  ;;  %v799_v15 = vld [vmem:[%s1759_s26 + $0x88] sm:$0xf]  ;;  %v800_v16 = vld [vmem:[%s1759_s26 + $0x8c] sm:$0xf]  ;;  %v1857_v18 = vmax.bf16 %v1704_v8, %v793_v1  ;;  %v1860_v19 = vmax.bf16 %v1704_v8, %v794_v2 }
  0x1d   : > { %v1434_v17 = vcombine.low %v1832_v5, %v1835_v6  ;;  %v1863_v20 = vmax.bf16 %v1704_v8, %v795_v3  ;;  %v1868_v22 = vmax.bf16 %v1704_v8, %v796_v9  ;;  %v1871_v23 = vmax.bf16 %v1704_v8, %v797_v10  ;;  %v241_v31 = vld [vmem:[%s1759_s26 + $0x54] sm:$0xf]  ;;  %v771_v32 = vld [vmem:[%s1759_s26 + $0x18] sm:$0xf]  ;;  %v243_v38 = vld [vmem:[%s1759_s26 + $0x5c] sm:$0xf] }
  0x1e   : > { %v1435_v21 = vcombine.low %v1838_v7, %v1849_v14  ;;  %v1874_v24 = vmax.bf16 %v1704_v8, %v798_v11  ;;  %v1876_v25 = vcombine.low %v268_v57, %v269_v58  ;;  %v1436_v26 = vcombine.low %v1857_v18, %v1860_v19  ;;  %v242_v37 = vld [vmem:[%s1759_s26 + $0x58] sm:$0xf]  ;;  %v773_v40 = vld [vmem:[%s1759_s26 + $0x20] sm:$0xf]  ;;  %v774_v41 = vld [vmem:[%s1759_s26 + $0x24] sm:$0xf] }
  0x1f   : > { %1518 = vmatmul.mubr.msk.bf16.gmra.mrb[4].mxu1 %vm378_vm1, %v1374_v35  ;;  %v1881_v27 = vmax.bf16 %v1704_v8, %v799_v15  ;;  %v1884_v28 = vmax.bf16 %v1704_v8, %v800_v16  ;;  %v1886_v29 = vcombine.low %v270_v61, %v271_v62  ;;  %v1437_v33 = vcombine.low %v1863_v20, %v1868_v22  ;;  %v245_v54 = vld [vmem:[%s1759_s26 + $0x64] sm:$0xf]  ;;  %v775_v55 = vld [vmem:[%s1759_s26 + $0x28] sm:$0xf]  ;;  %v776_v57 = vld [vmem:[%s1759_s26 + $0x2c] sm:$0xf] }
  0x20   : > { %1552 = vmatmul.mubr.msk.bf16.gmra.mrb[4].mxu0 %vm378_vm1, %v1373_v30  ;;  %1521 = vmatprep.mubr.msk.bf16.mxu1 %vm378_vm1, %v1375_v36  ;;  %v240_v30 = vld [vmem:[%s1759_s26 + $0x50] sm:$0xf]  ;;  %v1438_v34 = vcombine.low %v1871_v23, %v1874_v24  ;;  %v273_v43 = vmax.bf16 %v1704_v8, %v241_v31  ;;  %v803_v44 = vmax.bf16 %v1704_v8, %v771_v32  ;;  %v246_v58 = vld [vmem:[%s1759_s26 + $0x68] sm:$0xf]  ;;  %v247_v59 = vld [vmem:[%s1759_s26 + $0x6c] sm:$0xf] }
  0x21   : > { %1555 = vmatprep.mubr.msk.bf16.mxu0 %vm378_vm1, %v1374_v35  ;;  %v1424_v35 = vcombine.low %v801_v4, %v802_v12  ;;  %v1439_v39 = vcombine.low %v1881_v27, %v1884_v28  ;;  %v272_v42 = vmax.bf16 %v1704_v8, %v240_v30  ;;  %v274_v46 = vmax.bf16 %v1704_v8, %v242_v37  ;;  %v777_v60 = vld [vmem:[%s1759_s26 + $0x30] sm:$0xf]  ;;  %v778_v61 = vld [vmem:[%s1759_s26 + $0x34] sm:$0xf]  ;;  %v779_v32 = vld [vmem:[%s1759_s26 + $0x38] sm:$0xf] }
  0x22   : > { %v275_v47 = vmax.bf16 %v1704_v8, %v243_v38  ;;  %v805_v48 = vmax.bf16 %v1704_v8, %v773_v40  ;;  %v277_v1 = vmax.bf16 %v1704_v8, %v245_v54  ;;  %v807_v2 = vmax.bf16 %v1704_v8, %v775_v55  ;;  %v248_v30 = vld [vmem:[%s1759_s26 + $0x70] sm:$0xf]  ;;  %v249_v31 = vld [vmem:[%s1759_s26 + $0x74] sm:$0xf]  ;;  %v250_v37 = vld [vmem:[%s1759_s26 + $0x78] sm:$0xf] }
  0x23   : > { %v1916_v50 = vcombine.low %v272_v42, %v273_v43  ;;  %v808_v3 = vmax.bf16 %v1704_v8, %v776_v57  ;;  %v278_v4 = vmax.bf16 %v1704_v8, %v246_v58  ;;  %v279_v9 = vmax.bf16 %v1704_v8, %v247_v59  ;;  %v251_v38 = vld [vmem:[%s1759_s26 + $0x7c] sm:$0xf]  ;;  %v781_v40 = vld [vmem:[%s1759_s26 + $0x40] sm:$0xf]  ;;  %v783_v58 = vld [vmem:[%s1759_s26 + $0x48] sm:$0xf] }
  0x24   : > { %v1918_v52 = vcombine.low %v274_v46, %v275_v47  ;;  %v809_v10 = vmax.bf16 %v1704_v8, %v777_v60  ;;  %v810_v11 = vmax.bf16 %v1704_v8, %v778_v61  ;;  %v280_v42 = vmax.bf16 %v1704_v8, %v248_v30  ;;  %v286_v55 = vld [vmem:[%s1759_s26 + $0x80] sm:$0xf]  ;;  %v784_v59 = vld [vmem:[%s1759_s26 + $0x4c] sm:$0xf]  ;;  %v785_v60 = vld [vmem:[%s1759_s26 + $0x50] sm:$0xf] }
  0x25   : > { %v1427_v15 = vcombine.low %v807_v2, %v808_v3  ;;  %v1383_v16 = vcombine.low %v278_v4, %v279_v9  ;;  %v281_v43 = vmax.bf16 %v1704_v8, %v249_v31  ;;  %v282_v46 = vmax.bf16 %v1704_v8, %v250_v37  ;;  %v786_v61 = vld [vmem:[%s1759_s26 + $0x54] sm:$0xf] }
  0x26   : > { %v283_v47 = vmax.bf16 %v1704_v8, %v251_v38  ;;  %v815_v2 = vmax.bf16 %v1704_v8, %v783_v58  ;;  %v816_v3 = vmax.bf16 %v1704_v8, %v784_v59  ;;  %v817_v4 = vmax.bf16 %v1704_v8, %v785_v60 }
  0x27   : > { %1522 = vmatmul.mubr.msk.bf16.gmra.mrb[8].mxu1 %vm378_vm1, %v1376_v49  ;;  %v818_v9 = vmax.bf16 %v1704_v8, %v786_v61 }
  0x28   : > { %1556 = vmatmul.mubr.msk.bf16.gmra.mrb[8].mxu0 %vm378_vm1, %v1375_v36  ;;  %1525 = vmatprep.mubr.msk.bf16.mxu1 %vm378_vm1, %v1377_v53  ;;  %v772_v36 = vld [vmem:[%s1759_s26 + $0x1c] sm:$0xf]  ;;  %v1385_v54 = vcombine.low %v282_v46, %v283_v47 }
  0x29   : > { %1559 = vmatprep.mubr.msk.bf16.mxu0 %vm378_vm1, %v1376_v49  ;;  %v804_v45 = vmax.bf16 %v1704_v8, %v772_v36  ;;  %v806_v49 = vmax.bf16 %v1704_v8, %v774_v41  ;;  %v780_v36 = vld [vmem:[%s1759_s26 + $0x3c] sm:$0xf]  ;;  %v782_v41 = vld [vmem:[%s1759_s26 + $0x44] sm:$0xf] }
  0x2b   : > { %v1425_v51 = vcombine.low %v803_v44, %v804_v45  ;;  %v1426_v56 = vcombine.low %v805_v48, %v806_v49  ;;  %v811_v44 = vmax.bf16 %v1704_v8, %v779_v32  ;;  %v812_v45 = vmax.bf16 %v1704_v8, %v780_v36 }
  0x2c   : > { %v813_v48 = vmax.bf16 %v1704_v8, %v781_v40  ;;  %v814_v49 = vmax.bf16 %v1704_v8, %v782_v41 }
  0x2e   : > { %v1430_v57 = vcombine.low %v813_v48, %v814_v49 }
  0x2f   : > { %1526 = vmatmul.mubr.msk.bf16.gmra.mrb[12].mxu1 %vm378_vm1, %v1876_v25 }
  0x30   : > { %1560 = vmatmul.mubr.msk.bf16.gmra.mrb[12].mxu0 %vm378_vm1, %v1377_v53  ;;  %1529 = vmatprep.mubr.msk.bf16.mxu1 %vm378_vm1, %v1886_v29  ;;  %v244_v53 = vld [vmem:[%s1759_s26 + $0x60] sm:$0xf] }
  0x31   : > { %1581 = vmatprep.mubr.msk.bf16.mxu0 %vm378_vm1, %v1424_v35  ;;  %v276_v62 = vmax.bf16 %v1704_v8, %v244_v53  ;;  %v1428_v35 = vcombine.low %v809_v10, %v810_v11  ;;  %v1429_v53 = vcombine.low %v811_v44, %v812_v45  ;;  %v1431_v11 = vcombine.low %v815_v2, %v816_v3 }
  0x33   : > { %v1382_v12 = vcombine.low %v276_v62, %v277_v1  ;;  %v288_v62 = vmax.bf16 %v1704_v8, %v286_v55 }
  0x37   : > { %1530 = vmatmul.mubr.msk.bf16.gmra.mrb[16].mxu1 %vm378_vm1, %v1916_v50 }
  0x38   : > { %1582 = vmatmul.mubr.msk.bf16.vlgmr.msra.gmra.mrb[0].mxu0 %vm378_vm1, %v1425_v51  ;;  %1533 = vmatprep.mubr.msk.bf16.mxu1 %vm378_vm1, %v1918_v52  ;;  %v1384_v51 = vcombine.low %v280_v42, %v281_v43 }
  0x39   : > { %1585 = vmatprep.mubr.msk.bf16.mxu0 %vm378_vm1, %v1426_v56  ;;  %v287_v56 = vld [vmem:[%s1759_s26 + $0x84] sm:$0xf] }
  0x3a   : > { %v289_v1 = vmax.bf16 %v1704_v8, %v287_v56 }
  0x3c   : > { %v1386_v10 = vcombine.low %v288_v62, %v289_v1 }
  0x3f   : > { %1534 = vmatmul.mubr.msk.bf16.gmra.mrb[20].mxu1 %vm378_vm1, %v1382_v12 }
  0x40   : > { %1586 = vmatmul.mubr.msk.bf16.gmra.mrb[4].mxu0 %vm378_vm1, %v1427_v15  ;;  %1537 = vmatprep.mubr.msk.bf16.mxu1 %vm378_vm1, %v1383_v16  ;;  %v1432_v15 = vcombine.low %v817_v4, %v818_v9 }
  0x41   : > { %1589 = vmatprep.mubr.msk.bf16.mxu0 %vm378_vm1, %v1428_v35 }
  0x47   : > { %1538 = vmatmul.mubr.msk.bf16.gmra.mrb[24].mxu1 %vm378_vm1, %v1384_v51 }
  0x48   : > { %1590 = vmatmul.mubr.msk.bf16.gmra.mrb[8].mxu0 %vm378_vm1, %v1429_v53  ;;  %1541 = vmatprep.mubr.msk.bf16.mxu1 %vm378_vm1, %v1385_v54 }
  0x49   : > { %1593 = vmatprep.mubr.msk.bf16.mxu0 %vm378_vm1, %v1430_v57 }
  0x4f   : > { %1542 = vmatmul.mubr.msk.bf16.gmra.mrb[28].mxu1 %vm378_vm1, %v1386_v10 }
  0x50   : > { %1594 = vmatmul.mubr.msk.bf16.gmra.mrb[12].mxu0 %vm378_vm1, %v1431_v11  ;;  %1563 = vmatprep.mubr.msk.bf16.mxu1 %vm378_vm1, %v1876_v25 }
  0x51   : > { %1597 = vmatprep.mubr.msk.bf16.mxu0 %vm378_vm1, %v1432_v15 }
  0x57   : > { %1564 = vmatmul.mubr.msk.bf16.vlgmr.msra.gmra.mrb[16].mxu1 %vm378_vm1, %v1886_v29 }
  0x58   : > { %1598 = vmatmul.mubr.msk.bf16.gmra.mrb[16].mxu0 %vm378_vm1, %v1433_v13  ;;  %1567 = vmatprep.mubr.msk.bf16.mxu1 %vm378_vm1, %v1916_v50 }
  0x59   : > { %1601 = vmatprep.mubr.msk.bf16.mxu0 %vm378_vm1, %v1434_v17 }
  0x5f   : > { %1568 = vmatmul.mubr.msk.bf16.gmra.mrb[20].mxu1 %vm378_vm1, %v1918_v52 }
  0x60   : > { %1602 = vmatmul.mubr.msk.bf16.gmra.mrb[20].mxu0 %vm378_vm1, %v1435_v21  ;;  %1571 = vmatprep.mubr.msk.bf16.mxu1 %vm378_vm1, %v1382_v12 }
  0x61   : > { %1605 = vmatprep.mubr.msk.bf16.mxu0 %vm378_vm1, %v1436_v26 }
  0x67   : > { %1572 = vmatmul.mubr.msk.bf16.gmra.mrb[24].mxu1 %vm378_vm1, %v1383_v16 }
  0x68   : > { %1606 = vmatmul.mubr.msk.bf16.gmra.mrb[24].mxu0 %vm378_vm1, %v1437_v33  ;;  %1575 = vmatprep.mubr.msk.bf16.mxu1 %vm378_vm1, %v1384_v51 }
  0x69   : > { %1609 = vmatprep.mubr.msk.bf16.mxu0 %vm378_vm1, %v1438_v34 }
  0x6f   : > { %1576 = vmatmul.mubr.msk.bf16.gmra.mrb[28].mxu1 %vm378_vm1, %v1385_v54 }
  0x70   : > { %1610 = vmatmul.mubr.msk.bf16.gmra.mrb[28].mxu0 %vm378_vm1, %v1439_v39 }
  0xea   : > { %v1515_v8 = vpop.f32.mrb[0].mxu1 }
  0xeb   : > { %v465_v63 = vpop.f32.mrb[1].mxu1 }
  0xec   : > { %v1516_v0 = vpop.f32.mrb[2].mxu1 }
  0xed   : > { %v468_v5 = vpop.f32.mrb[3].mxu1 }
  0xf2   : > { %v1519_v6 = vpop.f32.mrb[4].mxu1 }
  0xf3   : > { %v481_v7 = vpop.f32.mrb[5].mxu1 }
  0xf4   : > { %v1520_v13 = vpop.f32.mrb[6].mxu1 }
  0xf5   : > { %v484_v14 = vpop.f32.mrb[7].mxu1 }
  0xfa   : > { %v1523_v17 = vpop.f32.mrb[8].mxu1 }
  0xfb   : > { %v497_v18 = vpop.f32.mrb[9].mxu1 }
  0xfc   : > { %v1524_v19 = vpop.f32.mrb[10].mxu1 }
  0xfd   : > { %v500_v20 = vpop.f32.mrb[11].mxu1 }
 0x102   : > { %v1527_v21 = vpop.f32.mrb[12].mxu1 }
 0x103   : > { %v513_v22 = vpop.f32.mrb[13].mxu1 }
 0x104   : > { %v1528_v23 = vpop.f32.mrb[14].mxu1 }
 0x105   : > { %v516_v24 = vpop.f32.mrb[15].mxu1 }
 0x10b   : > { %v1583_v25 = vpop.f32.mrb[0].mxu0 }
 0x10c   : > { %v1615_v26 = vadd.f32 %v1583_v25, %v1515_v8  ;;  %v1006_v27 = vpop.f32.mrb[1].mxu0 }
 0x10d   : > { %v1584_v28 = vpop.f32.mrb[2].mxu0  ;;  %v1616_v29 = vadd.f32 %v1006_v27, %v465_v63 }
 0x10e   : > { %v1617_v33 = vadd.f32 %v1584_v28, %v1516_v0  ;;  %v1009_v34 = vpop.f32.mrb[3].mxu0 }
 0x10f   : > { %v1618_v39 = vadd.f32 %v1009_v34, %v468_v5  ;;  %1165 = vxpose.xlu0.b32.start [1/16] (narrow) %v1616_v29, 8 }
 0x113   : > { %1166 = vxpose.xlu0.b32.cont [2/16] (narrow) %v1618_v39, 8  ;;  %v1587_v50 = vpop.f32.mrb[4].mxu0 }
 0x114   : > { %v1619_v52 = vadd.f32 %v1587_v50, %v1519_v6  ;;  %v1022_v12 = vpop.f32.mrb[5].mxu0 }
 0x115   : > { %v1620_v16 = vadd.f32 %v1022_v12, %v481_v7  ;;  %v1588_v30 = vpop.f32.mrb[6].mxu0 }
 0x116   : > { %v1621_v31 = vadd.f32 %v1588_v30, %v1520_v13  ;;  %v1025_v32 = vpop.f32.mrb[7].mxu0 }
 0x117   : > { %v1622_v35 = vadd.f32 %v1025_v32, %v484_v14  ;;  %1167 = vxpose.xlu0.b32.cont [3/16] (narrow) %v1615_v26, 8 }
 0x11b   : > { %1168 = vxpose.xlu0.b32.cont [4/16] (narrow) %v1617_v33, 8  ;;  %v1591_v36 = vpop.f32.mrb[8].mxu0 }
 0x11c   : > { %v1623_v37 = vadd.f32 %v1591_v36, %v1523_v17  ;;  %v1038_v38 = vpop.f32.mrb[9].mxu0 }
 0x11d   : > { %v1624_v40 = vadd.f32 %v1038_v38, %v497_v18  ;;  %v1592_v41 = vpop.f32.mrb[10].mxu0 }
 0x11e   : > { %v1625_v42 = vadd.f32 %v1592_v41, %v1524_v19  ;;  %v1041_v43 = vpop.f32.mrb[11].mxu0 }
 0x11f   : > { %v1626_v44 = vadd.f32 %v1041_v43, %v500_v20  ;;  %1169 = vxpose.xlu0.b32.cont [5/16] (narrow) %v1620_v16, 8 }
 0x123   : > { %1170 = vxpose.xlu0.b32.cont [6/16] (narrow) %v1622_v35, 8  ;;  %v1595_v45 = vpop.f32.mrb[12].mxu0 }
 0x124   : > { %v2021_v46 = vadd.f32 %v1595_v45, %v1527_v21  ;;  %v1054_v47 = vpop.f32.mrb[13].mxu0 }
 0x125   : > { %v1628_v48 = vadd.f32 %v1054_v47, %v513_v22  ;;  %v1596_v49 = vpop.f32.mrb[14].mxu0 }
 0x126   : > { %v2023_v51 = vadd.f32 %v1596_v49, %v1528_v23  ;;  %v1057_v53 = vpop.f32.mrb[15].mxu0 }
 0x127   : > { %v1630_v54 = vadd.f32 %v1057_v53, %v516_v24  ;;  %1171 = vxpose.xlu0.b32.cont [7/16] (narrow) %v1619_v52, 8 }
 0x12a   : > { %v1565_v55 = vpop.f32.mrb[16].mxu1 }
 0x12b   : > { %1172 = vxpose.xlu0.b32.cont [8/16] (narrow) %v1621_v31, 8  ;;  %v1599_v56 = vpop.f32.mrb[16].mxu0  ;;  %v706_v57 = vpop.f32.mrb[17].mxu1 }
 0x12c   : > { %v1631_v58 = vadd.f32 %v1599_v56, %v1565_v55  ;;  %v1070_v59 = vpop.f32.mrb[17].mxu0  ;;  %v1566_v60 = vpop.f32.mrb[18].mxu1 }
 0x12d   : > { %v1600_v61 = vpop.f32.mrb[18].mxu0  ;;  %v709_v62 = vpop.f32.mrb[19].mxu1  ;;  %v1632_v1 = vadd.f32 %v1070_v59, %v706_v57 }
 0x12e   : > { %v1633_v2 = vadd.f32 %v1600_v61, %v1566_v60  ;;  %v1073_v3 = vpop.f32.mrb[19].mxu0 }
 0x12f   : > { %v1634_v4 = vadd.f32 %v1073_v3, %v709_v62  ;;  %1173 = vxpose.xlu0.b32.cont [9/16] (narrow) %v1624_v40, 8  ;;  %1197 = vxpose.xlu1.b32.start [1/16] (narrow) %v1632_v1, 8 }
 0x132   : > { %v1569_v9 = vpop.f32.mrb[20].mxu1 }
 0x133   : > { %1174 = vxpose.xlu0.b32.cont [10/16] (narrow) %v1626_v44, 8  ;;  %1198 = vxpose.xlu1.b32.cont [2/16] (narrow) %v1634_v4, 8  ;;  %v1603_v10 = vpop.f32.mrb[20].mxu0  ;;  %v722_v11 = vpop.f32.mrb[21].mxu1 }
 0x134   : > { %v1635_v15 = vadd.f32 %v1603_v10, %v1569_v9  ;;  %v1086_v8 = vpop.f32.mrb[21].mxu0  ;;  %v1570_v63 = vpop.f32.mrb[22].mxu1 }
 0x135   : > { %v1636_v0 = vadd.f32 %v1086_v8, %v722_v11  ;;  %v1604_v5 = vpop.f32.mrb[22].mxu0  ;;  %v725_v6 = vpop.f32.mrb[23].mxu1 }
 0x136   : > { %v1637_v7 = vadd.f32 %v1604_v5, %v1570_v63  ;;  %v1089_v13 = vpop.f32.mrb[23].mxu0 }
 0x137   : > { %v1638_v14 = vadd.f32 %v1089_v13, %v725_v6  ;;  %1175 = vxpose.xlu0.b32.cont [11/16] (narrow) %v1623_v37, 8  ;;  %1199 = vxpose.xlu1.b32.cont [3/16] (narrow) %v1631_v58, 8 }
 0x13a   : > { %v1573_v17 = vpop.f32.mrb[24].mxu1 }
 0x13b   : > { %1176 = vxpose.xlu0.b32.cont [12/16] (narrow) %v1625_v42, 8  ;;  %1200 = vxpose.xlu1.b32.cont [4/16] (narrow) %v1633_v2, 8  ;;  %v1607_v18 = vpop.f32.mrb[24].mxu0  ;;  %v738_v19 = vpop.f32.mrb[25].mxu1 }
 0x13c   : > { %v1639_v20 = vadd.f32 %v1607_v18, %v1573_v17  ;;  %v1102_v21 = vpop.f32.mrb[25].mxu0  ;;  %v1574_v22 = vpop.f32.mrb[26].mxu1 }
 0x13d   : > { %v1640_v23 = vadd.f32 %v1102_v21, %v738_v19  ;;  %v1608_v24 = vpop.f32.mrb[26].mxu0  ;;  %v741_v25 = vpop.f32.mrb[27].mxu1 }
 0x13e   : > { %v1641_v26 = vadd.f32 %v1608_v24, %v1574_v22  ;;  %v1105_v27 = vpop.f32.mrb[27].mxu0 }
 0x13f   : > { %v1642_v28 = vadd.f32 %v1105_v27, %v741_v25  ;;  %1177 = vxpose.xlu0.b32.cont [13/16] (narrow) %v1628_v48, 8  ;;  %1201 = vxpose.xlu1.b32.cont [5/16] (narrow) %v1636_v0, 8 }
 0x142   : > { %v1577_v29 = vpop.f32.mrb[28].mxu1 }
 0x143   : > { %1178 = vxpose.xlu0.b32.cont [14/16] (narrow) %v1630_v54, 8  ;;  %1202 = vxpose.xlu1.b32.cont [6/16] (narrow) %v1638_v14, 8  ;;  %v1611_v33 = vpop.f32.mrb[28].mxu0  ;;  %v754_v34 = vpop.f32.mrb[29].mxu1 }
 0x144   : > { %v1643_v39 = vadd.f32 %v1611_v33, %v1577_v29  ;;  %v1118_v50 = vpop.f32.mrb[29].mxu0  ;;  %v1578_v52 = vpop.f32.mrb[30].mxu1 }
 0x145   : > { %v1644_v12 = vadd.f32 %v1118_v50, %v754_v34  ;;  %v1612_v16 = vpop.f32.mrb[30].mxu0  ;;  %v757_v30 = vpop.f32.mrb[31].mxu1 }
 0x146   : > { %v1645_v31 = vadd.f32 %v1612_v16, %v1578_v52  ;;  %v1121_v32 = vpop.f32.mrb[31].mxu0 }
 0x147   : > { %v1646_v35 = vadd.f32 %v1121_v32, %v757_v30  ;;  %1179 = vxpose.xlu0.b32.cont [15/16] (narrow) %v2021_v46, 8  ;;  %1203 = vxpose.xlu1.b32.cont [7/16] (narrow) %v1635_v15, 8 }
 0x14b   : > { %1180 = vxpose.xlu0.b32.end [16/16] (narrow) %v2023_v51, 8  ;;  %1204 = vxpose.xlu1.b32.cont [8/16] (narrow) %v1637_v7, 8 }
 0x14f   : > { %1205 = vxpose.xlu1.b32.cont [9/16] (narrow) %v1640_v23, 8 }
 0x153   : > { %1206 = vxpose.xlu1.b32.cont [10/16] (narrow) %v1642_v28, 8 }
 0x157   : > { %1207 = vxpose.xlu1.b32.cont [11/16] (narrow) %v1639_v20, 8 }
 0x15b   : > { %1208 = vxpose.xlu1.b32.cont [12/16] (narrow) %v1641_v26, 8 }
 0x15f   : > { %1209 = vxpose.xlu1.b32.cont [13/16] (narrow) %v1644_v12, 8 }
 0x163   : > { %1210 = vxpose.xlu1.b32.cont [14/16] (narrow) %v1646_v35, 8 }
 0x167   : > { %1211 = vxpose.xlu1.b32.cont [15/16] (narrow) %v1643_v39, 8 }
 0x16b   : > { %1212 = vxpose.xlu1.b32.end [16/16] (narrow) %v1645_v31, 8 }
 0x18f   : > { %v1181_v36 = vpop.trf.xlu0 }
 0x190   : > { %1229 = vst [vmem:[%s210_s30] sm:$0xff] %v1181_v36  ;;  %v1236_v37 = vmul.f32 %v1181_v36, %v1181_v36 }
 0x1af   : > { %v1213_v38 = vpop.trf.xlu1 }
 0x1b0   : > { %1230 = vst [vmem:[%s210_s30 + $0x8] sm:$0xff] %v1213_v38  ;;  %v1231_v40 = vadd.f32 %v1213_v38, %v1181_v36  ;;  %v1237_v41 = vmul.f32 %v1213_v38, %v1213_v38 }
 0x1b2   : > { %1232 = vadd.xlane.f32.xlu0 %v1231_v40  ;;  %v1238_v42 = vadd.f32 %v1237_v41, %v1236_v37 }
 0x1b4   : > { %1239 = vadd.xlane.f32.xlu1 %v1238_v42 }
 0x23f   : > { %v1233_v43 = vpop.xlane.xlu0 %1232 }
 0x240   : > { %1235 = vst.msk [vmem:[%s214_s8] sm:$0xff] %vm1234_vm2, %v1233_v43 }
 0x241   : > { %v1240_v44 = vpop.xlane.xlu1 %1239 }
 0x242   : > { %1241 = vst.msk [vmem:[%s218_s11] sm:$0xff] %vm1234_vm2, %v1240_v44 }
 0x243 PF: > { %s15_s15 = sadd.s32 1, %s1702_s15  }
 0x244   : > { %p12_p4 = scmp.ge.s32.totalorder %s15_s15, 4  }
 0x246   :  { %14 = sbr.rel (!%p12_p4) target bundleno = 1 (0x1), region = 84 }

</bundles_post_ra>
